<compile_context>
chip_gen: v5e
topology: v5e:2x2
jax: 0.10.0
libtpu: 0.0.40
codegen_flags: <defaults>
</compile_context>

<pallas_src>
import jax
import jax.numpy as jnp
from jax.experimental import pallas as pl
from jax.experimental.pallas import tpu as pltpu


def _sigmoid(x):
    # One EUP op (tanh), exact: sigmoid(x) = 0.5 * tanh(x/2) + 0.5.
    return 0.5 * jnp.tanh(0.5 * x) + 0.5


def _cbam_kernel(feat_ref, mask_ref, w1t_ref, w2t_ref, convA_ref, convX_ref,
                 out_ref):
    f = feat_ref[...]                         # (Bb, C, HW)  f32, lane-dense
    m = mask_ref[...]                         # (Bb, 1, HW)  f32
    Bb, C, HW = f.shape

    # ---------------- channel attention ----------------
    fm = f * m                                               # (Bb, C, HW)
    pool = jnp.sum(fm, axis=2) * (1.0 / HW)                  # (Bb, C) lane reduce
    h = jnp.dot(pool, w1t_ref[...],
                preferred_element_type=jnp.float32)          # (Bb, Cr)  MXU
    h = jnp.maximum(h, 0.0)
    ca_logit = jnp.dot(h, w2t_ref[...],
                       preferred_element_type=jnp.float32)   # (Bb, C)   MXU
    ca = _sigmoid(ca_logit)                                  # (Bb, C)
    fca = f * ca[:, :, None]                                 # (Bb, C, HW)

    # ---- spatial attention: fused zero-padded 7x7 conv as two MXU matmuls ----
    avg = jnp.sum(fca, axis=1) * (1.0 / C)                   # (Bb, HW)
    mx = jnp.max(fca, axis=1)                                # (Bb, HW)
    sa_logit = (
        jnp.dot(avg.astype(jnp.bfloat16), convA_ref[...],
                preferred_element_type=jnp.float32)
        + jnp.dot(mx.astype(jnp.bfloat16), convX_ref[...],
                  preferred_element_type=jnp.float32))       # (Bb, HW) f32 acc
    sa = _sigmoid(sa_logit)                                  # (Bb, HW)

    # ---- epilogue: fold sa*(mask+1) on the small row, one full-tile multiply ----
    scale = sa[:, None, :] * (m + 1.0)                       # (Bb, 1, HW)
    out_ref[...] = fca * scale                               # (Bb, C, HW)


def _build_conv_matrices(conv_w, H, W):
    """Encode the zero-padded KxK conv over [avg, max] as two (HW, HW) bf16
    matrices acting on flattened (row-major) spatial positions."""
    f32 = jnp.float32
    K = conv_w.shape[-1]
    P = K // 2
    HW = H * W
    wA = conv_w[0, 0].astype(f32)             # (K, K) weights for the avg map
    wX = conv_w[0, 1].astype(f32)             # (K, K) weights for the max map

    idx = jnp.arange(HW)
    i_in = (idx // W)[:, None]                # input (source) pixel coords
    j_in = (idx % W)[:, None]
    i_out = (idx // W)[None, :]               # output pixel coords
    j_out = (idx % W)[None, :]
    dy = i_in - i_out + P                     # (HW, HW) kernel-row index
    dx = j_in - j_out + P                     # (HW, HW) kernel-col index
    valid = (dy >= 0) & (dy < K) & (dx >= 0) & (dx < K)   # zero padding
    dy_c = jnp.clip(dy, 0, K - 1)
    dx_c = jnp.clip(dx, 0, K - 1)
    Ca = jnp.where(valid, wA[dy_c, dx_c], 0.0).astype(jnp.bfloat16)   # (HW, HW)
    Cx = jnp.where(valid, wX[dy_c, dx_c], 0.0).astype(jnp.bfloat16)   # (HW, HW)
    return Ca, Cx


def _pick_batch_block(B, max_bb=8):
    """Largest divisor of B that is <= max_bb while keeping >= 2 grid steps
    when B >= 2 (so both v7x TensorCores get work)."""
    if B <= 1:
        return max(B, 1)
    best = 1
    for bb in range(1, min(B, max_bb) + 1):
        if B % bb == 0 and B // bb >= 2:
            best = bb
    return best


def cbam_fusion_pallas(feat, mask, w1, w2, conv_w):
    """feat: (B,C,H,W), mask: (B,1,H,W), w1: (C//r, C), w2: (C, C//r),
    conv_w: (1,2,7,7). Returns (B,C,H,W) float32."""
    f32 = jnp.float32
    B, C, H, W = feat.shape
    Cr = w1.shape[0]
    HW = H * W

    # v7x VMEM guard: the dense conv matrices grow as 2*HW^2*2 bytes (bf16).
    # 16x16 -> 0.25 MiB, 32x32 -> 4 MiB, 64x64 -> 64 MiB (does not fit v7x).
    conv_mat_bytes = 2 * HW * HW * 2
    if conv_mat_bytes > (8 << 20):
        # TODO(synk): for large spatial sizes, tile the output-HW axis of the
        # conv matrices with an extra grid axis (or use a shifted-add 7x7 conv)
        # instead of the dense matrix; the dense form exceeds v7x VMEM budget.
        raise ValueError(
            f"dense 7x7 conv matrices need {conv_mat_bytes / 2**20:.1f} MiB "
            "VMEM; tile the spatial dimension for H*W this large.")

    # Lane-dense flattening of the spatial dims (free reshape of contiguous dims).
    feat_f = feat.astype(f32).reshape(B, C, HW)
    mask_f = mask.astype(f32).reshape(B, 1, HW)
    w1t = jnp.transpose(w1).astype(f32)       # (C, Cr):  pool @ w1t == pool @ W1^T
    w2t = jnp.transpose(w2).astype(f32)       # (Cr, C):  h @ w2t == h @ W2^T
    convA, convX = _build_conv_matrices(conv_w, H, W)   # (HW, HW) bf16 each

    Bb = _pick_batch_block(B)
    n_steps = B // Bb
    grid = (n_steps,)

    in_specs = [
        pl.BlockSpec((Bb, C, HW), lambda b: (b, 0, 0)),    # feat  (lane-dense)
        pl.BlockSpec((Bb, 1, HW), lambda b: (b, 0, 0)),    # mask
        pl.BlockSpec((C, Cr), lambda b: (0, 0)),           # fc1 weight (transposed)
        pl.BlockSpec((Cr, C), lambda b: (0, 0)),           # fc2 weight (transposed)
        pl.BlockSpec((HW, HW), lambda b: (0, 0)),          # conv matrix (avg path)
        pl.BlockSpec((HW, HW), lambda b: (0, 0)),          # conv matrix (max path)
    ]
    out_specs = pl.BlockSpec((Bb, C, HW), lambda b: (b, 0, 0))

    out = pl.pallas_call(
        _cbam_kernel,
        out_shape=jax.ShapeDtypeStruct((B, C, HW), f32),
        grid=grid,
        in_specs=in_specs,
        out_specs=out_specs,
        compiler_params=pltpu.CompilerParams(
            dimension_semantics=("parallel",)),
    )(feat_f, mask_f, w1t, w2t, convA, convX)
    return out.reshape(B, C, H, W)


def cbam_reference(feat, mask, w1, w2, conv_w):
    """Pure-JAX replica of the PyTorch forward (NCHW)."""
    mask_pool = jnp.mean(feat * mask, axis=(2, 3))            # (B, C)
    h = jax.nn.relu(mask_pool @ w1.T)                          # (B, C//r)
    w = jax.nn.sigmoid(h @ w2.T)                               # (B, C)
    feat2 = feat * w[:, :, None, None]
    avg = jnp.mean(feat2, axis=1, keepdims=True)
    mx = jnp.max(feat2, axis=1, keepdims=True)
    sa_in = jnp.concatenate([avg, mx], axis=1)                 # (B, 2, H, W)
    sa = jax.lax.conv_general_dilated(
        sa_in, conv_w, window_strides=(1, 1), padding=((3, 3), (3, 3)),
        dimension_numbers=("NCHW", "OIHW", "NCHW"))
    sa = jax.nn.sigmoid(sa)
    return feat2 * sa * (mask + 1.0)


if __name__ == "__main__":
    B, C, H, W = 2, 64, 16, 16
    reduction = 16
    Cr = C // reduction

    key = jax.random.PRNGKey(0)
    k1, k2, k3, k4, k5 = jax.random.split(key, 5)
    feat = jax.random.normal(k1, (B, C, H, W), dtype=jnp.float32)
    mask = jax.random.uniform(k2, (B, 1, H, W), dtype=jnp.float32)
    # Deterministic synthetic parameters (shapes from the module __init__).
    w1 = 0.1 * jax.random.normal(k3, (Cr, C), dtype=jnp.float32)        # ca_fc1.weight
    w2 = 0.1 * jax.random.normal(k4, (C, Cr), dtype=jnp.float32)        # ca_fc2.weight
    conv_w = 0.05 * jax.random.normal(k5, (1, 2, 7, 7), dtype=jnp.float32)  # sa_conv.weight

    out = cbam_fusion_pallas(feat, mask, w1, w2, conv_w)
    out = jax.block_until_ready(out)

    ref = cbam_reference(feat, mask, w1, w2, conv_w)
    err = float(jnp.max(jnp.abs(out - ref)))
    scale = float(jnp.max(jnp.abs(ref))) + 1e-6
    assert err <= 5e-3 * scale + 1e-4, f"mismatch vs reference: max abs err {err}"
    print("KERNEL_OK")
</pallas_src>

<mosaic_0001>
module attributes {stable_mosaic.version = 11 : i64} {
  func.func @_cbam_kernel(%arg0: i32, %arg1: memref<1x64x256xf32, #tpu.memory_space<vmem>>, %arg2: memref<1x1x256xf32, #tpu.memory_space<vmem>>, %arg3: memref<64x4xf32, #tpu.memory_space<vmem>>, %arg4: memref<4x64xf32, #tpu.memory_space<vmem>>, %arg5: memref<256x256xbf16, #tpu.memory_space<vmem>>, %arg6: memref<256x256xbf16, #tpu.memory_space<vmem>>, %arg7: memref<1x64x256xf32, #tpu.memory_space<vmem>>) attributes {dimension_semantics = [#tpu.dimension_semantics<parallel>], iteration_bounds = array<i64: 2>, scalar_prefetch = 0 : i64, scratch_operands = 0 : i64, tpu.core_type = #tpu.core_type<tc>, window_params = [{transform_indices = @transform_0, window_bounds = array<i64: 1, 64, 256>}, {transform_indices = @transform_1, window_bounds = array<i64: 1, 1, 256>}, {pipeline_mode = #tpu.pipeline_mode<synchronous>, transform_indices = @transform_2, window_bounds = array<i64: 64, 4>}, {pipeline_mode = #tpu.pipeline_mode<synchronous>, transform_indices = @transform_3, window_bounds = array<i64: 4, 64>}, {pipeline_mode = #tpu.pipeline_mode<synchronous>, transform_indices = @transform_4, window_bounds = array<i64: 256, 256>}, {pipeline_mode = #tpu.pipeline_mode<synchronous>, transform_indices = @transform_5, window_bounds = array<i64: 256, 256>}, {transform_indices = @transform_6, window_bounds = array<i64: 1, 64, 256>}]} {
    %c0 = arith.constant 0 : index
    %c0_0 = arith.constant 0 : index
    %c0_1 = arith.constant 0 : index
    %0 = vector.load %arg1[%c0, %c0_0, %c0_1] : memref<1x64x256xf32, #tpu.memory_space<vmem>>, vector<1x64x256xf32>
    %c0_2 = arith.constant 0 : index
    %c0_3 = arith.constant 0 : index
    %c0_4 = arith.constant 0 : index
    %1 = vector.load %arg2[%c0_2, %c0_3, %c0_4] : memref<1x1x256xf32, #tpu.memory_space<vmem>>, vector<1x1x256xf32>
    %2 = vector.broadcast %1 : vector<1x1x256xf32> to vector<1x64x256xf32>
    %3 = arith.mulf %0, %2 : vector<1x64x256xf32>
    %cst = arith.constant dense<0.000000e+00> : vector<1x64xf32>
    %4 = vector.multi_reduction <add>, %3, %cst [2] : vector<1x64x256xf32> to vector<1x64xf32>
    %cst_5 = arith.constant 3.906250e-03 : f32
    %5 = vector.broadcast %cst_5 : f32 to vector<1x64xf32>
    %6 = arith.mulf %4, %5 : vector<1x64xf32>
    %c0_6 = arith.constant 0 : index
    %c0_7 = arith.constant 0 : index
    %7 = vector.load %arg3[%c0_6, %c0_7] : memref<64x4xf32, #tpu.memory_space<vmem>>, vector<64x4xf32>
    %cst_8 = arith.constant dense<0.000000e+00> : vector<1x4xf32>
    %8 = tpu.matmul %6, %7, %cst_8 {dimension_numbers = #tpu.dot_dimension_numbers<[1], [0], [0], [1], [0, 0, 1, 1], [], []>} : vector<1x64xf32>, vector<64x4xf32>, vector<1x4xf32> -> vector<1x4xf32>
    %cst_9 = arith.constant 0.000000e+00 : f32
    %9 = vector.broadcast %cst_9 : f32 to vector<1x4xf32>
    %10 = arith.maximumf %8, %9 : vector<1x4xf32>
    %c0_10 = arith.constant 0 : index
    %c0_11 = arith.constant 0 : index
    %11 = vector.load %arg4[%c0_10, %c0_11] : memref<4x64xf32, #tpu.memory_space<vmem>>, vector<4x64xf32>
    %cst_12 = arith.constant dense<0.000000e+00> : vector<1x64xf32>
    %12 = tpu.matmul %10, %11, %cst_12 {dimension_numbers = #tpu.dot_dimension_numbers<[1], [0], [0], [1], [0, 0, 1, 1], [], []>} : vector<1x4xf32>, vector<4x64xf32>, vector<1x64xf32> -> vector<1x64xf32>
    %cst_13 = arith.constant 5.000000e-01 : f32
    %13 = vector.broadcast %cst_13 : f32 to vector<1x64xf32>
    %14 = arith.mulf %13, %12 : vector<1x64xf32>
    %15 = math.tanh %14 : vector<1x64xf32>
    %cst_14 = arith.constant 5.000000e-01 : f32
    %16 = vector.broadcast %cst_14 : f32 to vector<1x64xf32>
    %17 = arith.mulf %16, %15 : vector<1x64xf32>
    %cst_15 = arith.constant 5.000000e-01 : f32
    %18 = vector.broadcast %cst_15 : f32 to vector<1x64xf32>
    %19 = arith.addf %17, %18 : vector<1x64xf32>
    %20 = vector.shape_cast %19 : vector<1x64xf32> to vector<1x64x1xf32>
    %21 = vector.broadcast %20 : vector<1x64x1xf32> to vector<1x64x256xf32>
    %22 = arith.mulf %0, %21 : vector<1x64x256xf32>
    %cst_16 = arith.constant dense<0.000000e+00> : vector<1x256xf32>
    %23 = vector.multi_reduction <add>, %22, %cst_16 [1] : vector<1x64x256xf32> to vector<1x256xf32>
    %cst_17 = arith.constant 1.562500e-02 : f32
    %24 = vector.broadcast %cst_17 : f32 to vector<1x256xf32>
    %25 = arith.mulf %23, %24 : vector<1x256xf32>
    %cst_18 = arith.constant dense<0xFF800000> : vector<1x256xf32>
    %26 = vector.multi_reduction <maximumf>, %22, %cst_18 [1] : vector<1x64x256xf32> to vector<1x256xf32>
    %27 = arith.truncf %25 : vector<1x256xf32> to vector<1x256xbf16>
    %c0_19 = arith.constant 0 : index
    %c0_20 = arith.constant 0 : index
    %28 = vector.load %arg5[%c0_19, %c0_20] : memref<256x256xbf16, #tpu.memory_space<vmem>>, vector<256x256xbf16>
    %cst_21 = arith.constant dense<0.000000e+00> : vector<1x256xf32>
    %29 = tpu.matmul %27, %28, %cst_21 {dimension_numbers = #tpu.dot_dimension_numbers<[1], [0], [0], [1], [0, 0, 1, 1], [], []>} : vector<1x256xbf16>, vector<256x256xbf16>, vector<1x256xf32> -> vector<1x256xf32>
    %30 = arith.truncf %26 : vector<1x256xf32> to vector<1x256xbf16>
    %c0_22 = arith.constant 0 : index
    %c0_23 = arith.constant 0 : index
    %31 = vector.load %arg6[%c0_22, %c0_23] : memref<256x256xbf16, #tpu.memory_space<vmem>>, vector<256x256xbf16>
    %cst_24 = arith.constant dense<0.000000e+00> : vector<1x256xf32>
    %32 = tpu.matmul %30, %31, %cst_24 {dimension_numbers = #tpu.dot_dimension_numbers<[1], [0], [0], [1], [0, 0, 1, 1], [], []>} : vector<1x256xbf16>, vector<256x256xbf16>, vector<1x256xf32> -> vector<1x256xf32>
    %33 = arith.addf %29, %32 : vector<1x256xf32>
    %cst_25 = arith.constant 5.000000e-01 : f32
    %34 = vector.broadcast %cst_25 : f32 to vector<1x256xf32>
    %35 = arith.mulf %34, %33 : vector<1x256xf32>
    %36 = math.tanh %35 : vector<1x256xf32>
    %cst_26 = arith.constant 5.000000e-01 : f32
    %37 = vector.broadcast %cst_26 : f32 to vector<1x256xf32>
    %38 = arith.mulf %37, %36 : vector<1x256xf32>
    %cst_27 = arith.constant 5.000000e-01 : f32
    %39 = vector.broadcast %cst_27 : f32 to vector<1x256xf32>
    %40 = arith.addf %38, %39 : vector<1x256xf32>
    %41 = vector.shape_cast %40 : vector<1x256xf32> to vector<1x1x256xf32>
    %cst_28 = arith.constant 1.000000e+00 : f32
    %42 = vector.broadcast %cst_28 : f32 to vector<1x1x256xf32>
    %43 = arith.addf %1, %42 : vector<1x1x256xf32>
    %44 = arith.mulf %41, %43 : vector<1x1x256xf32>
    %45 = vector.broadcast %44 : vector<1x1x256xf32> to vector<1x64x256xf32>
    %46 = arith.mulf %22, %45 : vector<1x64x256xf32>
    %c0_29 = arith.constant 0 : index
    %c0_30 = arith.constant 0 : index
    %c0_31 = arith.constant 0 : index
    %47 = vector.load %arg7[%c0_29, %c0_30, %c0_31] : memref<1x64x256xf32, #tpu.memory_space<vmem>>, vector<1x64x256xf32>
    tpu.vector_store %arg7[%c0_29, %c0_30, %c0_31], %46 {strides = array<i32>} : memref<1x64x256xf32, #tpu.memory_space<vmem>>, vector<1x64x256xf32>,
    return
  }
  func.func @transform_0(%arg0: i32) -> (i32, i32, i32) {
    %c0_i32 = arith.constant 0 : i32
    %c0_i32_0 = arith.constant 0 : i32
    %c0_i32_1 = arith.constant 0 : i32
    return %arg0, %c0_i32, %c0_i32_0 : i32, i32, i32
  }
  func.func @transform_1(%arg0: i32) -> (i32, i32, i32) {
    %c0_i32 = arith.constant 0 : i32
    %c0_i32_0 = arith.constant 0 : i32
    %c0_i32_1 = arith.constant 0 : i32
    return %arg0, %c0_i32, %c0_i32_0 : i32, i32, i32
  }
  func.func @transform_2(%arg0: i32) -> (i32, i32) {
    %c0_i32 = arith.constant 0 : i32
    %c0_i32_0 = arith.constant 0 : i32
    %c0_i32_1 = arith.constant 0 : i32
    return %c0_i32, %c0_i32_0 : i32, i32
  }
  func.func @transform_3(%arg0: i32) -> (i32, i32) {
    %c0_i32 = arith.constant 0 : i32
    %c0_i32_0 = arith.constant 0 : i32
    %c0_i32_1 = arith.constant 0 : i32
    return %c0_i32, %c0_i32_0 : i32, i32
  }
  func.func @transform_4(%arg0: i32) -> (i32, i32) {
    %c0_i32 = arith.constant 0 : i32
    %c0_i32_0 = arith.constant 0 : i32
    %c0_i32_1 = arith.constant 0 : i32
    return %c0_i32, %c0_i32_0 : i32, i32
  }
  func.func @transform_5(%arg0: i32) -> (i32, i32) {
    %c0_i32 = arith.constant 0 : i32
    %c0_i32_0 = arith.constant 0 : i32
    %c0_i32_1 = arith.constant 0 : i32
    return %c0_i32, %c0_i32_0 : i32, i32
  }
  func.func @transform_6(%arg0: i32) -> (i32, i32, i32) {
    %c0_i32 = arith.constant 0 : i32
    %c0_i32_0 = arith.constant 0 : i32
    %c0_i32_1 = arith.constant 0 : i32
    return %arg0, %c0_i32, %c0_i32_0 : i32, i32, i32
  }
}

</mosaic_0001>

<bundles_post_ra>
// kernel: tpu_custom_call.1
= control target key start
LH: loop header
LB: loop body
LE: loop exit
PB: predicated region body
PF: predicated region fallthrough
CT: control target
= control target key end

     0   :  { %11 = vsyncpa [#allocation3], 0  ;;  %s2285_s0 = inlined_call_operand.hbm [shape: f32[2,64,256], index: 0, kind: input, shape index: {}]   ;;  %s2286_s1 = inlined_call_operand.vmem [shape: f32[2,1,256], index: 1, kind: input, shape index: {}]   ;;  %s2287_s2 = inlined_call_operand.vmem [shape: f32[64,4], index: 2, kind: input, shape index: {}]   ;;  %s2288_s3 = inlined_call_operand.vmem [shape: f32[4,64], index: 3, kind: input, shape index: {}]   ;;  %s2289_s4 = inlined_call_operand.hbm [shape: bf16[256,256], index: 4, kind: input, shape index: {}]   ;;  %s2290_s5 = inlined_call_operand.hbm [shape: bf16[256,256], index: 5, kind: input, shape index: {}]   ;;  %s2291_s6 = inlined_call_operand.hbm [shape: f32[2,64,256], index: 6, kind: output, shape index: {}]  }
   0x1   :  { %13 = vsyncpa [#allocation3 + $0x1], 0 }
   0x2   :  { %14 = vsyncpa [#allocation6], 0 }
   0x3   :  { %15 = vsyncpa [#allocation4], 0 }
   0x4   :  { %17 = vsyncpa [#allocation4 + $0x1], 0  ;;  %s1915_s21 = smov 0   ;;  %s1917_s22 = smov 0  }
   0x5   :  { %s1919_s23 = smov 0   ;;  %s1921_s24 = smov 0  }
   0x6 LB: > { %s1936_s25 = sadd.s32 4294967295, %s1870_s24   ;;  %s1277_s26 = sadd.s32 4294967294, %s1870_s24   ;;  %s1870_s24 = sphi %s1921_s24, %s2301_s24   ;;  %s1866_s23 = sphi %s1919_s23, %s2300_s23   ;;  %s1862_s22 = sphi %s1917_s22, %s2299_s22   ;;  %s1858_s21 = sphi %s1915_s21, %s2298_s21  }
   0x7   : > { %p43_p0 = scmp.ne.s32.totalorder %s1862_s22, %s1858_s21  ;;  %p44_p1 = scmp.eq.s32.totalorder %s1936_s25, 0 }
   0x8   : > { %p177_p2 = scmp.eq.s32.totalorder %s1936_s25, 1  ;;  %p183_p3 = scmp.eq.s32.totalorder %s1277_s26, 1 }
   0x9   : > { %p1945_p4 = por %p44_p1, %p43_p0  ;;  %p1278_p5 = scmp.ge.s32.totalorder %s1870_s24, 1 }
   0xa   : > { %p1950_p6 = por %p183_p3, %p43_p0  ;;  %p190_p7 = scmp.lt.s32.totalorder %s1870_s24, 3 }
   0xb   : > { %s207_s7 = sshll.u32 %s2289_s4, 4  ;;  %s1872_s9 = smov [#allocation5]   ;;  %s208_s7 = int_to_ptr.hbm [resolvable:$true] %s207_s7 }
   0xc   : > { %p1958_p8 = pnand %p1278_p5, %p190_p7  ;;  %s209_s10 = sshll.u32 %s1872_s9, 4  ;;  %s210_s10 = int_to_ptr.vmem [resolvable:$true] %s209_s10 }
   0xd   : > { %s221_s13 = sshll.u32 %s2290_s5, 4  ;;  %s1873_s14 = smov 128   ;;  %s222_s13 = int_to_ptr.hbm [resolvable:$true] %s221_s13 }
   0xe   : > { %p1633_p9 = pneg %p1958_p8  ;;  %s1874_s15 = smov 8  }
   0xf   : > { %s1875_s16 = smov [#allocation7]   ;;  %s1971_s18 = sadd.s32 1, %s1870_s24  }
  0x10   : > { %p1634_p10 = pnand %p1633_p9, %p44_p1  ;;  %s223_s17 = sshll.u32 %s1875_s16, 4  ;;  %s224_s17 = int_to_ptr.vmem [resolvable:$true] %s223_s17 }
  0x11   : > { %s30_s19 = sadd.s32 1, %s1866_s23  ;;  %s27_s20 = ssub.s32 %s1870_s24, %s1971_s18 }
  0x12   : > { %1636 = dma.hbm_to_vmem [thread:$0]  (!%p1634_p10), %s208_s7, 4096, %s210_s10, [#allocation6], %s1873_s14, %s1873_s14, %s1874_s15  }
  0x13   : > { %1639 = dma.hbm_to_vmem [thread:$0]  (!%p1634_p10), %s222_s13, 4096, %s224_s17, [#allocation6], %s1873_s14, %s1873_s14, %s1874_s15  }
  0x14   : > { %p37_p12 = scmp.ne.s32.totalorder %s1866_s23, %s1862_s22  ;;  %p28_p13 = scmp.eq.s32.totalorder %s27_s20, 0 }
  0x15   : > { %p38_p0 = scmp.eq.s32.totalorder %s1870_s24, 0  ;;  %p1650_p5 = scmp.lt.s32.totalorder %s1870_s24, 2 }
  0x16   : > { %p1981_p3 = por %p177_p2, %p37_p12  ;;  %s237_s30 = sand.u32 1, %s1866_s23  }
  0x17   : > { %s1987_s29 = scalar_select %p28_p13, %s1866_s23, %s30_s19  }
  0x18   : > { %p39_p7 = por %p38_p0, %p37_p12  ;;  %s1282_s7 = sshll.u32 %s237_s30, 7 }
  0x19   : > { %s1555_s9 = sshll.u32 %s1870_s24, 7  ;;  %s241_s13 = scalar_lea.vmem [#allocation2], %s1282_s7 }
  0x1a   : > { %s246_s12 = scalar_lea.hbm %s2285_s0, %s1555_s9  ;;  %s249_s14 = sshll.u32 %s241_s13, 4  ;;  %s250_s14 = int_to_ptr.vmem [resolvable:$true] %s249_s14 }
  0x1b   : > { %s247_s15 = sshll.u32 %s246_s12, 4  ;;  %p1994_p2 = pnand %p1650_p5, %p39_p7  ;;  %s248_s15 = int_to_ptr.hbm [resolvable:$true] %s247_s15 }
  0x1c   : > { %s238_s17 = scalar_lea.sflag [#allocation3], %s237_s30  ;;  %s1770_s19 = sshra.s32 %s248_s15, 4  ;;  %s1771_s19 = int_to_ptr.hbm [resolvable:$true] %s1770_s19 }
  0x1d   : > { %s1772_s20 = scalar_lea.hbm %s1771_s19, 128  ;;  %p1774_p10 = pneg %p1994_p2 }
  0x1e   : > { %p1773_p9 = scmp.ne.s32.totalorder %s1771_s19, %s1772_s20  ;;  %s1777_s10 = scalar_lea.hbm %s2285_s0, 256 }
  0x1f   : > { %p1778_p0 = scmp.lt.s32.totalorder %s1771_s19, %s2285_s0  ;;  %p1779_p5 = scmp.lt.s32.totalorder %s1777_s10, %s1772_s20 }
  0x20   : > { %p1775_p12 = pnand %p1774_p10, %p1773_p9 }
  0x21   : > { %p1780_p7 = por %p1779_p5, %p1778_p0 }
  0x22   : > { %p1776_p13 = pneg %p1775_p12 }
  0x24   : > { %p1781_p11 = pnand %p1780_p7, %p1776_p13 }
  0x26   : > { %1784 = shalt.err (!%p1781_p11)
}
  0x27   : > { %s1876_s30 = smov 256   ;;  %s1877_s13 = smov 16  }
  0x28   : > { %1643 = dma.hbm_to_vmem [thread:$0]  (!%p1994_p2), %s248_s15, 2048, %s250_s14, %s238_s17, %s1876_s30, %s1876_s30, %s1877_s13  }
  0x29   : > { %268 = sbr.rel (%p1958_p8) target bundleno = 821 (0x335), region = 44  ;;  %s2011_s9 = sand.u32 (!%p1958_p8), 1, %s1862_s22  }
  0x2a   : > { %s1286_s19 = sshll.u32 (!%p1958_p8), %s2011_s9, 7  ;;  %s271_s20 = scalar_lea.sflag (!%p1958_p8), [#allocation3], %s2011_s9 }
  0x2b   : > { %s2017_s7 = scalar_lea.vmem (!%p1958_p8), [#allocation2], %s1286_s19 }
  0x2e   : > { %1845 = dma.done.wait (%p1945_p4), %s271_s20, 2048  }
  0x2f   : > { %1847 = vsyncadd (%p1945_p4), %s271_s20, 4294965248 }
  0x30   : > { %1849 = dma.done.wait (%p44_p1), [#allocation6], 8192  }
  0x31   : > { %1851 = vsyncadd (%p44_p1), [#allocation6], 4294959104  ;;  %p318_p8 = scmp.lt.s32.totalorder %s1936_s25, 1  ;;  %v2035_v0 = vld [vmem:[%s2017_s7] sm:$0xff]  ;;  %v2038_v1 = vld [vmem:[%s2017_s7 + $0x8] sm:$0xff]  ;;  %v408_v51 = vlaneseq  ;;  %vm413_vm0 = vcmask 130112  }
  0x32   : > { %v2042_v5 = vld [vmem:[%s2017_s7 + $0x20] sm:$0xff]  ;;  %v2045_v6 = vld [vmem:[%s2017_s7 + $0x28] sm:$0xff]  ;;  %v2058_v13 = vld [vmem:[%s2017_s7 + $0x10] sm:$0xff]  ;;  %vm417_vm1 = vcmask 195712   ;;  %vm421_vm2 = vcmask 261312   ;;  %vm425_vm3 = vcmask 326912  }
  0x33   : > { %s319_s8 = scalar_select %p318_p8, %s1936_s25, 1  ;;  %v2048_v7 = vld [vmem:[%s2017_s7 + $0x40] sm:$0xff]  ;;  %v2051_v8 = vld [vmem:[%s2017_s7 + $0x48] sm:$0xff]  ;;  %v2063_v16 = vld [vmem:[%s2017_s7 + $0x18] sm:$0xff]  ;;  %v409_v55 = vand.u32 127, %v408_v51  ;;  %vm429_vm4 = vcmask 392512  }
  0x34   : > { %v2066_v17 = vld [vmem:[%s2017_s7 + $0x30] sm:$0xff]  ;;  %v2069_v18 = vld [vmem:[%s2017_s7 + $0x38] sm:$0xff]  ;;  %v2084_v32 = vld [vmem:[%s2017_s7 + $0x60] sm:$0xff]  ;;  %vm433_vm5 = vcmask 458112   ;;  %vm437_vm6 = vcmask 523712   ;;  %vm439_vm7 = vcmask 523264  }
  0x35   : > { %s1290_s14 = sshll.u32 %s319_s8, 1  ;;  %v2072_v21 = vld [vmem:[%s2017_s7 + $0x50] sm:$0xff]  ;;  %v2075_v22 = vld [vmem:[%s2017_s7 + $0x58] sm:$0xff]  ;;  %v2087_v34 = vld [vmem:[%s2017_s7 + $0x68] sm:$0xff]  ;;  %v411_v57 = vadd.s32 4294967288, %v409_v55  ;;  %v419_v58 = vadd.s32 4294967272, %v409_v55 }
  0x36   : > { %s2032_s16 = scalar_lea.vmem %s2286_s1, %s1290_s14  ;;  %v2090_v35 = vld [vmem:[%s2017_s7 + $0x70] sm:$0xff]  ;;  %v2093_v36 = vld [vmem:[%s2017_s7 + $0x78] sm:$0xff]  ;;  %v397_v45 = vld [vmem:[%s2287_s2 + $0x28] sm:$0xff]  ;;  %v415_v59 = vadd.s32 4294967280, %v409_v55  ;;  %vm468_vm8 = vcmask 1043456   ;;  %vm464_vm9 = vcmask 31744  }
  0x37   : > { %v338_v2 = vld [vmem:[%s2032_s16] sm:$0x3]  ;;  %v399_v43 = vld [vmem:[%s2287_s2 + $0x38] sm:$0xff]  ;;  %v398_v44 = vld [vmem:[%s2287_s2 + $0x30] sm:$0xff]  ;;  %s1158_s27 = scalar_lea.sflag [#allocation4], %s2011_s9  ;;  %s1820_s12 = scalar_lea.hbm %s2291_s6, 256 }
  0x38   : > { %v340_v3 = vperm.slane %v338_v2, 0  ;;  %v341_v4 = vperm.slane %v338_v2, 1  ;;  %450 = vmatpush.msra.mxu0 %v399_v43  ;;  %v396_v46 = vld [vmem:[%s2287_s2 + $0x20] sm:$0xff]  ;;  %v395_v47 = vld [vmem:[%s2287_s2 + $0x18] sm:$0xff]  ;;  %v394_v48 = vld [vmem:[%s2287_s2 + $0x10] sm:$0xff] }
  0x39   : > { %v393_v49 = vld [vmem:[%s2287_s2 + $0x8] sm:$0xff]  ;;  %v392_v50 = vld [vmem:[%s2287_s2] sm:$0xff] }
  0x3a   : > { %v344_v9 = vmul.f32 %v340_v3, %v2035_v0  ;;  %v345_v10 = vmul.f32 %v341_v4, %v2038_v1  ;;  %v348_v11 = vmul.f32 %v340_v3, %v2042_v5  ;;  %v349_v12 = vmul.f32 %v341_v4, %v2045_v6  ;;  %451 = vmatpush.msra.mxu0 %v398_v44  ;;  %v463_v43 = vld [vmem:[%s2288_s3] sm:$0xf] }
  0x3b   : > { %v352_v14 = vmul.f32 %v340_v3, %v2048_v7  ;;  %v353_v15 = vmul.f32 %v341_v4, %v2051_v8  ;;  %v346_v24 = vmul.f32 %v340_v3, %v2058_v13  ;;  %v347_v25 = vmul.f32 %v341_v4, %v2063_v16  ;;  %1292 = vmatpush.msk.msra.mxu1 %vm468_vm8, %v463_v43 }
  0x3c   : > { %v360_v19 = vadd.f32 %v345_v10, %v344_v9  ;;  %v366_v20 = vadd.f32 %v349_v12, %v348_v11  ;;  %v350_v26 = vmul.f32 %v340_v3, %v2066_v17  ;;  %v351_v27 = vmul.f32 %v341_v4, %v2069_v18  ;;  %452 = vmatpush.msra.mxu0 %v397_v45 }
  0x3d   : > { %v372_v23 = vadd.f32 %v353_v15, %v352_v14  ;;  %v354_v28 = vmul.f32 %v340_v3, %v2072_v21  ;;  %v355_v29 = vmul.f32 %v341_v4, %v2075_v22  ;;  %v363_v30 = vadd.f32 %v347_v25, %v346_v24 }
  0x3e   : > { %361 = vadd.xlane.f32.xlu0 %v360_v19  ;;  %367 = vadd.xlane.f32.xlu1 %v366_v20  ;;  %v369_v31 = vadd.f32 %v351_v27, %v350_v26  ;;  %v356_v37 = vmul.f32 %v340_v3, %v2084_v32  ;;  %v357_v38 = vmul.f32 %v341_v4, %v2087_v34  ;;  %v427_v15 = vadd.s32 4294967256, %v409_v55 }
  0x3f   : > { %373 = vadd.xlane.f32.xlu2 %v372_v23  ;;  %v375_v33 = vadd.f32 %v355_v29, %v354_v28  ;;  %v358_v39 = vmul.f32 %v340_v3, %v2090_v35  ;;  %v359_v40 = vmul.f32 %v341_v4, %v2093_v36  ;;  %453 = vmatpush.msra.mxu0 %v396_v46  ;;  %v423_v4 = vadd.s32 4294967264, %v409_v55 }
  0x40   : > { %v378_v41 = vadd.f32 %v357_v38, %v356_v37  ;;  %v431_v26 = vadd.s32 4294967248, %v409_v55  ;;  %v435_v27 = vadd.s32 4294967240, %v409_v55  ;;  %v498_v46 = vshrl.u32 %v408_v51, 7 }
  0x41   : > { %v381_v42 = vadd.f32 %v359_v40, %v358_v39  ;;  %454 = vmatpush.msra.mxu0 %v395_v47 }
  0x42   : > { %1694 = vset.pattern.permute.xlu2 %v498_v46  ;;  %v511_v47 = vadd.s32 16, %v498_v46  ;;  %v523_v51 = vadd.s32 32, %v498_v46 }
  0x43   : > { %455 = vmatpush.msra.mxu0 %v394_v48  ;;  %v505_v48 = vadd.s32 8, %v498_v46 }
  0x44   : > { %1696 = vset.pattern.permute.xlu1 %v511_v47 }
  0x45   : > { %456 = vmatpush.msra.mxu0 %v393_v49  ;;  %1695 = vset.pattern.permute.xlu0 %v505_v48  ;;  %v1328_v48 = vld [vmem:[#allocation7 + $0x40] sm:$0xf] }
  0x46   : > { %364 = vadd.xlane.f32.xlu0 %v363_v30  ;;  %370 = vadd.xlane.f32.xlu1 %v369_v31 }
  0x47   : > { %376 = vadd.xlane.f32.xlu2 %v375_v33  ;;  %457 = vmatpush.msra.mxu0 %v392_v50 }
  0x4e   : > { %379 = vadd.xlane.f32.xlu0 %v378_v41  ;;  %382 = vadd.xlane.f32.xlu1 %v381_v42 }
  0xb1   : > { %v362_v52 = vpop.xlane.xlu0 %361  ;;  %v368_v53 = vpop.xlane.xlu1 %367 }
  0xb2   : > { %v374_v54 = vpop.xlane.xlu2 %373  ;;  %v384_v56 = vmul.f32 0.00390625, %v362_v52  ;;  %v386_v60 = vmul.f32 0.00390625, %v368_v53 }
  0xb3   : > { %v388_v10 = vmul.f32 0.00390625, %v374_v54 }
  0xb4   : > { %v410_v9 = vperm.slane %v384_v56, %v409_v55  ;;  %v416_v14 = vperm.slane %v386_v60, %v415_v59  ;;  %v529_v56 = vadd.s32 40, %v498_v46  ;;  %v535_v59 = vadd.s32 48, %v498_v46  ;;  %v1352_v60 = vld [vmem:[#allocation7 + $0x70] sm:$0xf] }
  0xb5   : > { %v424_v24 = vperm.slane %v388_v10, %v423_v4  ;;  %v1354_v4 = vld [vmem:[#allocation7 + $0x78] sm:$0xf0] }
  0xb9   : > { %v365_v61 = vpop.xlane.xlu0 %364  ;;  %v371_v62 = vpop.xlane.xlu1 %370 }
  0xba   : > { %v385_v63 = vmul.f32 0.00390625, %v365_v61  ;;  %v387_v2 = vmul.f32 0.00390625, %v371_v62  ;;  %v377_v3 = vpop.xlane.xlu2 %376  ;;  %v1603_v61 = vld [vmem:[#allocation7 + $0x74] sm:$0xf0]  ;;  %v1416_v62 = vld [vmem:[#allocation7 + $0xf0] sm:$0xf] }
  0xbb   : > { %v389_v19 = vmul.f32 0.00390625, %v377_v3  ;;  %v1602_v3 = vld [vmem:[#allocation7 + $0x74] sm:$0xf] }
  0xbc   : > { %v412_v11 = vperm.slane %v385_v63, %v411_v57  ;;  %v420_v12 = vperm.slane %v387_v2, %v419_v58  ;;  %v517_v57 = vadd.s32 24, %v498_v46  ;;  %v541_v58 = vadd.s32 56, %v498_v46  ;;  %v1619_v2 = vld [vmem:[#allocation7 + $0xf4] sm:$0xf0]  ;;  %v1402_v46 = vld [vmem:[#allocation7 + $0xd8] sm:$0xf0] }
  0xbd   : > { %v428_v28 = vperm.slane %v389_v19, %v427_v15  ;;  %v1353_v63 = vor.u32 %v1603_v61, %v1352_v60  ;;  %v1357_v10 = vor.u32 %v1602_v3, %v1354_v4  ;;  %v1344_v15 = vld [vmem:[#allocation7 + $0x60] sm:$0xf]  ;;  %v1601_v19 = vld [vmem:[#allocation7 + $0x64] sm:$0xf0]  ;;  %v1320_v60 = vld [vmem:[#allocation7 + $0x30] sm:$0xf] }
  0xbe   : > { %v414_v20 = vsel %vm413_vm0, %v412_v11, %v410_v9  ;;  %v1417_v9 = vor.u32 %v1619_v2, %v1416_v62  ;;  %v1618_v11 = vld [vmem:[#allocation7 + $0xf4] sm:$0xf]  ;;  %v1595_v61 = vld [vmem:[#allocation7 + $0x34] sm:$0xf0]  ;;  %v1384_v62 = vld [vmem:[#allocation7 + $0xb0] sm:$0xf] }
  0xbf   : > { %v418_v23 = vsel %vm417_vm1, %v416_v14, %v414_v20  ;;  %843 = vmatpush.bf16.msra.mxu2 %v1353_v63  ;;  %869 = vmatpush.bf16.msrb.mxu1 %v1357_v10  ;;  %v1408_v20 = vld [vmem:[#allocation7 + $0xe0] sm:$0xf]  ;;  %v1321_v63 = vor.u32 %v1595_v61, %v1320_v60  ;;  %v1611_v2 = vld [vmem:[#allocation7 + $0xb4] sm:$0xf0]  ;;  %v1594_v3 = vld [vmem:[#allocation7 + $0x34] sm:$0xf] }
  0xc0   : > { %v422_v25 = vsel %vm421_vm2, %v420_v12, %v418_v23  ;;  %v1418_v12 = vld [vmem:[#allocation7 + $0xf8] sm:$0xf0]  ;;  %856 = vmatpush.bf16.msra.mxu3 %v1417_v9  ;;  %v1345_v23 = vor.u32 %v1601_v19, %v1344_v15  ;;  %v1385_v9 = vor.u32 %v1611_v2, %v1384_v62  ;;  %v1312_v15 = vld [vmem:[#allocation7 + $0x20] sm:$0xf]  ;;  %v1593_v19 = vld [vmem:[#allocation7 + $0x24] sm:$0xf0] }
  0xc1   : > { %v380_v29 = vpop.xlane.xlu0 %379  ;;  %v383_v30 = vpop.xlane.xlu1 %382  ;;  %v426_v37 = vsel %vm425_vm3, %v424_v24, %v422_v25  ;;  %v1421_v14 = vor.u32 %v1618_v11, %v1418_v12  ;;  %v1617_v24 = vld [vmem:[#allocation7 + $0xe4] sm:$0xf0]  ;;  %v1600_v25 = vld [vmem:[#allocation7 + $0x64] sm:$0xf]  ;;  %v1322_v4 = vld [vmem:[#allocation7 + $0x38] sm:$0xf0] }
  0xc2   : > { %v390_v31 = vmul.f32 0.00390625, %v380_v29  ;;  %v391_v33 = vmul.f32 0.00390625, %v383_v30  ;;  %v430_v40 = vsel %vm429_vm4, %v428_v28, %v426_v37  ;;  %v1616_v29 = vld [vmem:[#allocation7 + $0xe4] sm:$0xf]  ;;  %v1410_v30 = vld [vmem:[#allocation7 + $0xe8] sm:$0xf0]  ;;  %v1325_v10 = vor.u32 %v1594_v3, %v1322_v4 }
  0xc3   : > { %882 = vmatpush.bf16.msrb.mxu0 %v1421_v14  ;;  %844 = vmatpush.bf16.msra.mxu2 %v1345_v23  ;;  %v1599_v37 = vld [vmem:[#allocation7 + $0x54] sm:$0xf0]  ;;  %v1610_v11 = vld [vmem:[#allocation7 + $0xb4] sm:$0xf]  ;;  %v1386_v12 = vld [vmem:[#allocation7 + $0xb8] sm:$0xf0]  ;;  %v1313_v23 = vor.u32 %v1593_v19, %v1312_v15 }
  0xc4   : > { %v432_v38 = vperm.slane %v390_v31, %v431_v26  ;;  %v436_v39 = vperm.slane %v391_v33, %v435_v27  ;;  %v1346_v26 = vld [vmem:[#allocation7 + $0x68] sm:$0xf0]  ;;  %v1409_v27 = vor.u32 %v1617_v24, %v1408_v20  ;;  %v1413_v31 = vor.u32 %v1616_v29, %v1410_v30  ;;  %v1336_v33 = vld [vmem:[#allocation7 + $0x50] sm:$0xf]  ;;  %v1376_v20 = vld [vmem:[#allocation7 + $0xa0] sm:$0xf] }
  0xc5   : > { %v1349_v28 = vor.u32 %v1600_v25, %v1346_v26  ;;  %v1389_v14 = vor.u32 %v1610_v11, %v1386_v12  ;;  %v1609_v24 = vld [vmem:[#allocation7 + $0xa4] sm:$0xf0]  ;;  %v1592_v25 = vld [vmem:[#allocation7 + $0x24] sm:$0xf]  ;;  %v1314_v26 = vld [vmem:[#allocation7 + $0x28] sm:$0xf0] }
  0xc6   : > { %v434_v41 = vsel %vm433_vm5, %v432_v38, %v430_v40  ;;  %857 = vmatpush.bf16.msra.mxu3 %v1409_v27  ;;  %v1400_v38 = vld [vmem:[#allocation7 + $0xd0] sm:$0xf]  ;;  %v1615_v40 = vld [vmem:[#allocation7 + $0xd4] sm:$0xf0]  ;;  %v1377_v27 = vor.u32 %v1609_v24, %v1376_v20  ;;  %v1608_v29 = vld [vmem:[#allocation7 + $0xa4] sm:$0xf] }
  0xc7   : > { %v438_v42 = vsel %vm437_vm6, %v436_v39, %v434_v41  ;;  %870 = vmatpush.bf16.msrb.mxu1 %v1349_v28  ;;  %883 = vmatpush.bf16.msrb.mxu0 %v1413_v31  ;;  %v1337_v39 = vor.u32 %v1599_v37, %v1336_v33  ;;  %v1598_v41 = vld [vmem:[#allocation7 + $0x54] sm:$0xf]  ;;  %v1401_v43 = vor.u32 %v1615_v40, %v1400_v38  ;;  %v1378_v30 = vld [vmem:[#allocation7 + $0xa8] sm:$0xf0]  ;;  %v1304_v33 = vld [vmem:[#allocation7 + $0x10] sm:$0xf] }
  0xc8   : > { %1291 = vmatmul.msk.f32.vlgmr.msra.gmra.mxu0 %vm439_vm7, %v438_v42  ;;  %v1338_v42 = vld [vmem:[#allocation7 + $0x58] sm:$0xf0]  ;;  %v1317_v28 = vor.u32 %v1592_v25, %v1314_v26  ;;  %v1381_v31 = vor.u32 %v1608_v29, %v1378_v30  ;;  %v1591_v37 = vld [vmem:[#allocation7 + $0x14] sm:$0xf0]  ;;  %v1368_v38 = vld [vmem:[#allocation7 + $0x90] sm:$0xf] }
  0xc9   : > { %845 = vmatpush.bf16.msra.mxu2 %v1337_v39  ;;  %v1305_v39 = vor.u32 %v1591_v37, %v1304_v33  ;;  %v1607_v40 = vld [vmem:[#allocation7 + $0x94] sm:$0xf0]  ;;  %v1480_v60 = vld [vmem:[#allocation5 + $0x70] sm:$0xf]  ;;  %v1586_v11 = vld [vmem:[#allocation5 + $0xf4] sm:$0xf] }
  0xca   : > { %858 = vmatpush.bf16.msra.mxu3 %v1401_v43  ;;  %v1571_v62 = vld [vmem:[#allocation5 + $0x74] sm:$0xf0]  ;;  %v1472_v15 = vld [vmem:[#allocation5 + $0x60] sm:$0xf]  ;;  %v1569_v19 = vld [vmem:[#allocation5 + $0x64] sm:$0xf0] }
  0xcb   : > { %v1587_v2 = vld [vmem:[#allocation5 + $0xf4] sm:$0xf0]  ;;  %v1481_v3 = vor.u32 %v1571_v62, %v1480_v60  ;;  %v1473_v24 = vor.u32 %v1569_v19, %v1472_v15  ;;  %v1536_v25 = vld [vmem:[#allocation5 + $0xe0] sm:$0xf]  ;;  %v1585_v26 = vld [vmem:[#allocation5 + $0xe4] sm:$0xf0] }
  0xcc   : > { %v1537_v29 = vor.u32 %v1585_v26, %v1536_v25  ;;  %v1474_v30 = vld [vmem:[#allocation5 + $0x68] sm:$0xf0]  ;;  %v1562_v25 = vld [vmem:[#allocation5 + $0x34] sm:$0xf]  ;;  %v1450_v26 = vld [vmem:[#allocation5 + $0x38] sm:$0xf0] }
  0xcd   : > { %v1538_v33 = vld [vmem:[#allocation5 + $0xe8] sm:$0xf0] }
  0xce   : > { %v1458_v60 = vld [vmem:[#allocation5 + $0x48] sm:$0xf0] }
  0xcf   : > { %v1522_v62 = vld [vmem:[#allocation5 + $0xc8] sm:$0xf0] }
 0x145   : > { %v459_v44 = vpop.f32.mrf.mxu0 }
 0x146   : > { %v462_v45 = vmax.f32 %v459_v44, 0.0  ;;  %v1341_v44 = vor.u32 %v1598_v41, %v1338_v42  ;;  %v1590_v41 = vld [vmem:[#allocation7 + $0x14] sm:$0xf]  ;;  %v1306_v42 = vld [vmem:[#allocation7 + $0x18] sm:$0xf0] }
 0x148   : > { %1293 = vmatmul.msk.f32.vlgmr.msra.gmra.mxu1 %vm464_vm9, %v462_v45  ;;  %v1614_v45 = vld [vmem:[#allocation7 + $0xd4] sm:$0xf] }
 0x149   : > { %v1405_v47 = vor.u32 %v1614_v45, %v1402_v46  ;;  %871 = vmatpush.bf16.msrb.mxu1 %v1341_v44  ;;  %v1606_v44 = vld [vmem:[#allocation7 + $0x94] sm:$0xf]  ;;  %v1370_v45 = vld [vmem:[#allocation7 + $0x98] sm:$0xf0]  ;;  %v1369_v46 = vor.u32 %v1607_v40, %v1368_v38  ;;  %v1567_v40 = vld [vmem:[#allocation5 + $0x54] sm:$0xf0] }
 0x14b   : > { %884 = vmatpush.bf16.msrb.mxu0 %v1405_v47  ;;  %v1309_v47 = vor.u32 %v1590_v41, %v1306_v42  ;;  %v1528_v41 = vld [vmem:[#allocation5 + $0xd0] sm:$0xf]  ;;  %v1583_v42 = vld [vmem:[#allocation5 + $0xd4] sm:$0xf0] }
 0x1c5   : > { %v489_v49 = vpop.f32.mrf.mxu1 }
 0x1c6   : > { %v492_v50 = vmul.f32 0.5, %v489_v49  ;;  %v1597_v49 = vld [vmem:[#allocation7 + $0x44] sm:$0xf0] }
 0x1c8   : > { %1703 = vtanh.f32 %v492_v50  ;;  %v1392_v50 = vld [vmem:[#allocation7 + $0xc0] sm:$0xf] }
 0x1ce   : > { %v1704_v52 = vpop.eup %1703 }
 0x1cf   : > { %v494_v53 = vmul.f32 0.5, %v1704_v52  ;;  %v1329_v52 = vor.u32 %v1597_v49, %v1328_v48  ;;  %v1373_v48 = vor.u32 %v1606_v44, %v1370_v45  ;;  %v1296_v49 = vld [vmem:[#allocation7] sm:$0xf]  ;;  %v1566_v44 = vld [vmem:[#allocation5 + $0x54] sm:$0xf] }
 0x1d0   : > { %v1466_v45 = vld [vmem:[#allocation5 + $0x58] sm:$0xf0] }
 0x1d1   : > { %v495_v54 = vadd.f32 0.5, %v494_v53  ;;  %v1613_v53 = vld [vmem:[#allocation7 + $0xc4] sm:$0xf0]  ;;  %846 = vmatpush.bf16.msra.mxu2 %v1329_v52  ;;  %v1360_v52 = vld [vmem:[#allocation7 + $0x80] sm:$0xf] }
 0x1d3   : > { %v496_v55 = vperm.slane %v495_v54, 0  ;;  %v1596_v54 = vld [vmem:[#allocation7 + $0x44] sm:$0xf] }
 0x1d5   : > { %513 = vperm.xlu1 %1696, %v496_v55   ;;  %507 = vperm.xlu0 %1695, %v496_v55  }
 0x1d6   : > { %501 = vperm.xlu2 %1694, %v496_v55   ;;  %847 = vmatpush.bf16.msra.mxu2 %v1321_v63  ;;  %v1544_v63 = vld [vmem:[#allocation5 + $0xf0] sm:$0xf] }
 0x1d7   : > { %v1545_v4 = vor.u32 %v1587_v2, %v1544_v63 }
 0x1da   : > { %848 = vmatpush.bf16.msra.mxu2 %v1313_v23 }
 0x1dd   : > { %1699 = vset.pattern.permute.xlu1 %v529_v56  ;;  %1702 = vset.pattern.permute.xlu0 %v541_v58  ;;  %v1393_v56 = vor.u32 %v1613_v53, %v1392_v50  ;;  %v1589_v50 = vld [vmem:[#allocation7 + $0x4] sm:$0xf0] }
 0x1de   : > { %1697 = vset.pattern.permute.xlu2 %v517_v57  ;;  %849 = vmatpush.bf16.msra.mxu2 %v1305_v39  ;;  %v1297_v53 = vor.u32 %v1589_v50, %v1296_v49  ;;  %v1464_v39 = vld [vmem:[#allocation5 + $0x50] sm:$0xf]  ;;  %v1582_v49 = vld [vmem:[#allocation5 + $0xd4] sm:$0xf]  ;;  %v1530_v50 = vld [vmem:[#allocation5 + $0xd8] sm:$0xf0] }
 0x1df   : > { %859 = vmatpush.bf16.msra.mxu3 %v1393_v56  ;;  %v1298_v56 = vld [vmem:[#allocation7 + $0x8] sm:$0xf0] }
 0x1e2   : > { %850 = vmatpush.bf16.msra.mxu2 %v1297_v53  ;;  %v1529_v53 = vor.u32 %v1583_v42, %v1528_v41  ;;  %v1577_v41 = vld [vmem:[#allocation5 + $0xa4] sm:$0xf0] }
 0x1e3   : > { %860 = vmatpush.bf16.msra.mxu3 %v1385_v9  ;;  %v1570_v9 = vld [vmem:[#allocation5 + $0x74] sm:$0xf] }
 0x1e5   : > { %531 = vperm.xlu1 %1699, %v496_v55  }
 0x1e6   : > { %519 = vperm.xlu2 %1697, %v496_v55   ;;  %1055 = vmatpush.bf16.msrb.mxu2 %v1481_v3 }
 0x1e7   : > { %861 = vmatpush.bf16.msra.mxu3 %v1377_v27  ;;  %v1568_v27 = vld [vmem:[#allocation5 + $0x64] sm:$0xf] }
 0x1e8   : > { %v1477_v37 = vor.u32 %v1568_v27, %v1474_v30  ;;  %v1440_v30 = vld [vmem:[#allocation5 + $0x20] sm:$0xf] }
 0x1ea   : > { %1056 = vmatpush.bf16.msrb.mxu2 %v1473_v24  ;;  %v1579_v24 = vld [vmem:[#allocation5 + $0xb4] sm:$0xf0] }
 0x1eb   : > { %862 = vmatpush.bf16.msra.mxu3 %v1369_v46 }
 0x1ed   : > { %1701 = vset.pattern.permute.xlu1 %v541_v58  ;;  %v1612_v58 = vld [vmem:[#allocation7 + $0xc4] sm:$0xf] }
 0x1ee   : > { %1698 = vset.pattern.permute.xlu2 %v523_v51  ;;  %v1394_v51 = vld [vmem:[#allocation7 + $0xc8] sm:$0xf0] }
 0x1f5   : > { %543 = vperm.xlu1 %1701, %v496_v55  }
 0x1f6   : > { %525 = vperm.xlu2 %1698, %v496_v55  }
 0x1fe   : > { %1700 = vset.pattern.permute.xlu2 %v535_v59  ;;  %v1397_v59 = vor.u32 %v1612_v58, %v1394_v51  ;;  %v1604_v51 = vld [vmem:[#allocation7 + $0x84] sm:$0xf] }
 0x200   : > { %885 = vmatpush.bf16.msrb.mxu0 %v1397_v59  ;;  %v1362_v59 = vld [vmem:[#allocation7 + $0x88] sm:$0xf0] }
 0x201   : > { %v1365_v61 = vor.u32 %v1604_v51, %v1362_v59  ;;  %v1581_v51 = vld [vmem:[#allocation5 + $0xc4] sm:$0xf0]  ;;  %v1564_v59 = vld [vmem:[#allocation5 + $0x44] sm:$0xf] }
 0x204   : > { %886 = vmatpush.bf16.msrb.mxu0 %v1389_v14  ;;  %v1546_v14 = vld [vmem:[#allocation5 + $0xf8] sm:$0xf0] }
 0x205   : > { %v1549_v23 = vor.u32 %v1586_v11, %v1546_v14  ;;  %v1448_v11 = vld [vmem:[#allocation5 + $0x30] sm:$0xf] }
 0x206   : > { %537 = vperm.xlu2 %1700, %v496_v55   ;;  %v1330_v55 = vld [vmem:[#allocation7 + $0x48] sm:$0xf0]  ;;  %v1512_v14 = vld [vmem:[#allocation5 + $0xb0] sm:$0xf] }
 0x207   : > { %v1333_v57 = vor.u32 %v1596_v54, %v1330_v55  ;;  %v1605_v54 = vld [vmem:[#allocation7 + $0x84] sm:$0xf0]  ;;  %v1588_v55 = vld [vmem:[#allocation7 + $0x4] sm:$0xf] }
 0x208   : > { %887 = vmatpush.bf16.msrb.mxu0 %v1381_v31  ;;  %v1301_v58 = vor.u32 %v1588_v55, %v1298_v56  ;;  %v1584_v31 = vld [vmem:[#allocation5 + $0xe4] sm:$0xf]  ;;  %v1456_v55 = vld [vmem:[#allocation5 + $0x40] sm:$0xf]  ;;  %v1565_v56 = vld [vmem:[#allocation5 + $0x44] sm:$0xf0] }
 0x209   : > { %872 = vmatpush.bf16.msrb.mxu1 %v1333_v57  ;;  %v1361_v57 = vor.u32 %v1605_v54, %v1360_v52  ;;  %v1541_v38 = vor.u32 %v1584_v31, %v1538_v33  ;;  %v1469_v54 = vor.u32 %v1566_v44, %v1466_v45  ;;  %v1560_v44 = vld [vmem:[#allocation5 + $0x24] sm:$0xf]  ;;  %v1442_v45 = vld [vmem:[#allocation5 + $0x28] sm:$0xf0] }
 0x20b   : > { %863 = vmatpush.bf16.msra.mxu3 %v1361_v57  ;;  %v1520_v57 = vld [vmem:[#allocation5 + $0xc0] sm:$0xf] }
 0x20c   : > { %888 = vmatpush.bf16.msrb.mxu0 %v1373_v48  ;;  %v1465_v48 = vor.u32 %v1567_v40, %v1464_v39  ;;  %v1561_v39 = vld [vmem:[#allocation5 + $0x24] sm:$0xf0]  ;;  %v1504_v40 = vld [vmem:[#allocation5 + $0xa0] sm:$0xf] }
 0x20d   : > { %873 = vmatpush.bf16.msrb.mxu1 %v1325_v10  ;;  %v1482_v10 = vld [vmem:[#allocation5 + $0x78] sm:$0xf0] }
 0x20e   : > { %v1485_v12 = vor.u32 %v1570_v9, %v1482_v10  ;;  %1057 = vmatpush.bf16.msrb.mxu2 %v1465_v48  ;;  %v1576_v48 = vld [vmem:[#allocation5 + $0xa4] sm:$0xf] }
 0x20f   : > { %1068 = vmatpush.bf16.msrb.mxu3 %v1545_v4 }
 0x210   : > { %889 = vmatpush.bf16.msrb.mxu0 %v1365_v61  ;;  %v1580_v61 = vld [vmem:[#allocation5 + $0xc4] sm:$0xf] }
 0x211   : > { %874 = vmatpush.bf16.msrb.mxu1 %v1317_v28  ;;  %v1525_v10 = vor.u32 %v1580_v61, %v1522_v62 }
 0x213   : > { %1069 = vmatpush.bf16.msrb.mxu3 %v1537_v29  ;;  %v1514_v29 = vld [vmem:[#allocation5 + $0xb8] sm:$0xf0] }
 0x214   : > { %1094 = vmatpush.bf16.msra.mxu0 %v1549_v23 }
 0x215   : > { %875 = vmatpush.bf16.msrb.mxu1 %v1309_v47 }
 0x217   : > { %1070 = vmatpush.bf16.msrb.mxu3 %v1529_v53  ;;  %v1445_v53 = vor.u32 %v1560_v44, %v1442_v45 }
 0x218   : > { %1095 = vmatpush.bf16.msra.mxu0 %v1541_v38 }
 0x219   : > { %876 = vmatpush.bf16.msrb.mxu1 %v1301_v58 }
 0x21d   : > { %1081 = vmatpush.bf16.msra.mxu1 %v1485_v12  ;;  %v1563_v12 = vld [vmem:[#allocation5 + $0x34] sm:$0xf0] }
 0x21e   : > { %v1449_v23 = vor.u32 %v1563_v12, %v1448_v11  ;;  %v1424_v12 = vld [vmem:[#allocation5] sm:$0xf] }
 0x221   : > { %1082 = vmatpush.bf16.msra.mxu1 %v1477_v37 }
 0x225   : > { %1083 = vmatpush.bf16.msra.mxu1 %v1469_v54  ;;  %v1432_v54 = vld [vmem:[#allocation5 + $0x10] sm:$0xf] }
 0x230   : > { %v2126_v43 = vpop.permute.xlu2 %501 }
 0x231   : > { %v2138_v58 = vmul.f32 %v2126_v43, %v2035_v0  ;;  %v1457_v0 = vor.u32 %v1565_v56, %v1456_v55  ;;  %v1559_v55 = vld [vmem:[#allocation5 + $0x14] sm:$0xf0]  ;;  %v1496_v56 = vld [vmem:[#allocation5 + $0x90] sm:$0xf] }
 0x232   : > { %v1433_v11 = vor.u32 %v1559_v55, %v1432_v54 }
 0x233   : > { %1058 = vmatpush.bf16.msrb.mxu2 %v1457_v0  ;;  %v1498_v0 = vld [vmem:[#allocation5 + $0x98] sm:$0xf0] }
 0x237   : > { %1059 = vmatpush.bf16.msrb.mxu2 %v1449_v23  ;;  %v1573_v23 = vld [vmem:[#allocation5 + $0x84] sm:$0xf0] }
 0x240   : > { %v2128_v20 = vpop.permute.xlu2 %519 }
 0x241   : > { %v2158_v31 = vmul.f32 %v2128_v20, %v2066_v17  ;;  %v2162_v33 = vmul.f32 %v2128_v20, %v2069_v18  ;;  %v1441_v20 = vor.u32 %v1561_v39, %v1440_v30 }
 0x243   : > { %1060 = vmatpush.bf16.msrb.mxu2 %v1441_v20 }
 0x247   : > { %v508_v28 = vpop.permute.xlu0 %507  ;;  %v514_v52 = vpop.permute.xlu1 %513  ;;  %1061 = vmatpush.bf16.msrb.mxu2 %v1433_v11 }
 0x248   : > { %v2131_v46 = vmul.f32 %v508_v28, %v2058_v13  ;;  %v2134_v47 = vmul.f32 %v508_v28, %v2063_v16  ;;  %v2142_v13 = vmul.f32 %v2126_v43, %v2038_v1  ;;  %v1533_v16 = vor.u32 %v1582_v49, %v1530_v50  ;;  %v1578_v28 = vld [vmem:[#allocation5 + $0xb4] sm:$0xf]  ;;  %v1506_v50 = vld [vmem:[#allocation5 + $0xa8] sm:$0xf0] }
 0x249   : > { %v1521_v1 = vor.u32 %v1581_v51, %v1520_v57  ;;  %v1461_v43 = vor.u32 %v1564_v59, %v1458_v60  ;;  %v2149_v4 = vmul.f32 %v514_v52, %v2042_v5  ;;  %v2152_v9 = vmul.f32 %v514_v52, %v2045_v6  ;;  %v1575_v59 = vld [vmem:[#allocation5 + $0x94] sm:$0xf0]  ;;  %v1434_v60 = vld [vmem:[#allocation5 + $0x18] sm:$0xf0] }
 0x24a   : > { %v561_v63 = vadd.f32 %v2131_v46, %v2138_v58  ;;  %v574_v2 = vadd.f32 %v2134_v47, %v2142_v13  ;;  %1096 = vmatpush.bf16.msra.mxu0 %v1533_v16  ;;  %v1513_v5 = vor.u32 %v1579_v24, %v1512_v14  ;;  %v1453_v6 = vor.u32 %v1562_v25, %v1450_v26  ;;  %v1557_v14 = vld [vmem:[#allocation5 + $0x4] sm:$0xf0]  ;;  %v1556_v24 = vld [vmem:[#allocation5 + $0x4] sm:$0xf] }
 0x24b   : > { %1071 = vmatpush.bf16.msrb.mxu3 %v1521_v1  ;;  %1084 = vmatpush.bf16.msra.mxu1 %v1461_v43  ;;  %v1517_v38 = vor.u32 %v1578_v28, %v1514_v29  ;;  %v589_v57 = vmax.f32 %v2138_v58, %v2149_v4  ;;  %v1509_v51 = vor.u32 %v1576_v48, %v1506_v50  ;;  %v1490_v28 = vld [vmem:[#allocation5 + $0x88] sm:$0xf0] }
 0x24c   : > { %v562_v15 = vadd.f32 %v561_v63, %v2149_v4  ;;  %v575_v19 = vadd.f32 %v574_v2, %v2152_v9  ;;  %v590_v61 = vmax.f32 %v2131_v46, %v2158_v31  ;;  %v603_v1 = vmax.f32 %v2134_v47, %v2162_v33 }
 0x24d   : > { %v1425_v48 = vor.u32 %v1557_v14, %v1424_v12 }
 0x24e   : > { %1097 = vmatpush.bf16.msra.mxu0 %v1525_v10  ;;  %v563_v17 = vadd.f32 %v562_v15, %v2158_v31  ;;  %v576_v49 = vadd.f32 %v575_v19, %v2162_v33  ;;  %v1488_v19 = vld [vmem:[#allocation5 + $0x80] sm:$0xf] }
 0x24f   : > { %1072 = vmatpush.bf16.msrb.mxu3 %v1513_v5  ;;  %1085 = vmatpush.bf16.msra.mxu1 %v1453_v6  ;;  %v1426_v5 = vld [vmem:[#allocation5 + $0x8] sm:$0xf0]  ;;  %v1572_v6 = vld [vmem:[#allocation5 + $0x84] sm:$0xf] }
 0x250   : > { %v526_v3 = vpop.permute.xlu2 %525  ;;  %1062 = vmatpush.bf16.msrb.mxu2 %v1425_v48 }
 0x251   : > { %v2165_v37 = vmul.f32 %v526_v3, %v2048_v7  ;;  %v2168_v42 = vmul.f32 %v526_v3, %v2051_v8  ;;  %v1505_v8 = vor.u32 %v1577_v41, %v1504_v40  ;;  %v1574_v3 = vld [vmem:[#allocation5 + $0x94] sm:$0xf] }
 0x252   : > { %1098 = vmatpush.bf16.msra.mxu0 %v1517_v38 }
 0x253   : > { %v564_v16 = vadd.f32 %v563_v17, %v2165_v37  ;;  %v577_v62 = vadd.f32 %v576_v49, %v2168_v42  ;;  %v591_v43 = vmax.f32 %v589_v57, %v2165_v37  ;;  %1073 = vmatpush.bf16.msrb.mxu3 %v1505_v8  ;;  %1086 = vmatpush.bf16.msra.mxu1 %v1445_v53 }
 0x254   : > { %v1489_v17 = vor.u32 %v1573_v23, %v1488_v19  ;;  %v1429_v49 = vor.u32 %v1556_v24, %v1426_v5 }
 0x256   : > { %1099 = vmatpush.bf16.msra.mxu0 %v1509_v51 }
 0x257   : > { %v532_v27 = vpop.permute.xlu1 %531 }
 0x258   : > { %v2173_v18 = vmul.f32 %v532_v27, %v2072_v21  ;;  %v2176_v52 = vmul.f32 %v532_v27, %v2075_v22  ;;  %v602_v21 = vmax.f32 %v2142_v13, %v2152_v9  ;;  %v1558_v22 = vld [vmem:[#allocation5 + $0x14] sm:$0xf]  ;;  %v1501_v27 = vor.u32 %v1574_v3, %v1498_v0 }
 0x25a   : > { %v565_v10 = vadd.f32 %v564_v16, %v2173_v18  ;;  %v578_v15 = vadd.f32 %v577_v62, %v2176_v52  ;;  %v604_v25 = vmax.f32 %v602_v21, %v2168_v42  ;;  %v592_v26 = vmax.f32 %v590_v61, %v2173_v18  ;;  %1100 = vmatpush.bf16.msra.mxu0 %v1501_v27 }
 0x25b   : > { %v605_v29 = vmax.f32 %v603_v1, %v2176_v52 }
 0x260   : > { %v538_v7 = vpop.permute.xlu2 %537 }
 0x261   : > { %v2187_v63 = vmul.f32 %v538_v7, %v2084_v32  ;;  %v2190_v2 = vmul.f32 %v538_v7, %v2087_v34  ;;  %v1497_v32 = vor.u32 %v1575_v59, %v1496_v56  ;;  %v1437_v34 = vor.u32 %v1558_v22, %v1434_v60 }
 0x262   : > { %v1493_v7 = vor.u32 %v1572_v6, %v1490_v28 }
 0x263   : > { %v566_v30 = vadd.f32 %v565_v10, %v2187_v63  ;;  %v579_v38 = vadd.f32 %v578_v15, %v2190_v2  ;;  %v593_v39 = vmax.f32 %v591_v43, %v2187_v63  ;;  %v606_v41 = vmax.f32 %v604_v25, %v2190_v2  ;;  %1074 = vmatpush.bf16.msrb.mxu3 %v1497_v32 }
 0x264   : > { %1087 = vmatpush.bf16.msra.mxu1 %v1437_v34  ;;  %1101 = vmatpush.bf16.msra.mxu0 %v1493_v7 }
 0x267   : > { %v544_v40 = vpop.permute.xlu1 %543  ;;  %1075 = vmatpush.bf16.msrb.mxu3 %v1489_v17 }
 0x268   : > { %v2205_v44 = vmul.f32 %v544_v40, %v2090_v35  ;;  %v2208_v45 = vmul.f32 %v544_v40, %v2093_v36  ;;  %1088 = vmatpush.bf16.msra.mxu1 %v1429_v49 }
 0x26a   : > { %v567_v20 = vadd.f32 %v566_v30, %v2205_v44  ;;  %v580_v50 = vadd.f32 %v579_v38, %v2208_v45  ;;  %v594_v8 = vmax.f32 %v592_v26, %v2205_v44  ;;  %v607_v53 = vmax.f32 %v605_v29, %v2208_v45 }
 0x26c   : > { %v595_v35 = vmax.f32 %v593_v39, %v594_v8  ;;  %v608_v54 = vmax.f32 %v606_v41, %v607_v53  ;;  %v568_v36 = vrot.slane %v567_v20, 4  ;;  %v581_v55 = vrot.slane %v580_v50, 4 }
 0x26e   : > { %v596_v56 = vrot.slane %v595_v35, 4  ;;  %v609_v57 = vrot.slane %v608_v54, 4  ;;  %v569_v51 = vadd.f32 %v568_v36, %v567_v20  ;;  %v582_v59 = vadd.f32 %v581_v55, %v580_v50 }
 0x270   : > { %v597_v21 = vmax.f32 %v595_v35, %v596_v56  ;;  %v610_v16 = vmax.f32 %v608_v54, %v609_v57  ;;  %v570_v1 = vrot.slane %v569_v51, 2  ;;  %v583_v43 = vrot.slane %v582_v59, 2  ;;  %v1709_v57 = vld [vmem:[%s2032_s16] sm:$0x3]  ;;  %s2222_s16 = scalar_lea.vmem [#allocation8], %s1286_s19  ;;  %s1620_s19 = sshll.u32 %s1936_s25, 7 }
 0x271   : > { %s1169_s8 = scalar_lea.hbm %s2291_s6, %s1620_s19  ;;  %s1170_s25 = sshll.u32 %s2222_s16, 4  ;;  %s1171_s25 = int_to_ptr.vmem [resolvable:$true] %s1170_s25 }
 0x272   : > { %v598_v22 = vrot.slane %v597_v21, 2  ;;  %v611_v60 = vrot.slane %v610_v16, 2  ;;  %v571_v15 = vadd.f32 %v570_v1, %v569_v51  ;;  %v584_v32 = vadd.f32 %v583_v43, %v582_v59  ;;  %s1172_s14 = sshll.u32 %s1169_s8, 4  ;;  %s1173_s14 = int_to_ptr.hbm [resolvable:$true] %s1172_s14 }
 0x273   : > { %s1814_s15 = sshra.s32 %s1173_s14, 4  ;;  %s1815_s15 = int_to_ptr.hbm [resolvable:$true] %s1814_s15 }
 0x274   : > { %v599_v61 = vmax.f32 %v597_v21, %v598_v22  ;;  %v612_v62 = vmax.f32 %v610_v16, %v611_v60  ;;  %v572_v34 = vrot.slane %v571_v15, 1  ;;  %v585_v19 = vrot.slane %v584_v32, 1  ;;  %s1816_s17 = scalar_lea.hbm %s1815_s15, 128  ;;  %p1821_p2 = scmp.lt.s32.totalorder %s1815_s15, %s2291_s6 }
 0x275   : > { %v1115_v21 = vadd.f32 1.0, %v1709_v57  ;;  %p1817_p1 = scmp.ne.s32.totalorder %s1815_s15, %s1816_s17  ;;  %p1822_p9 = scmp.lt.s32.totalorder %s1820_s12, %s1816_s17 }
 0x276   : > { %v600_v3 = vrot.slane %v599_v61, 1  ;;  %v613_v0 = vrot.slane %v612_v62, 1  ;;  %v573_v23 = vadd.f32 %v572_v34, %v571_v15  ;;  %v586_v24 = vadd.f32 %v585_v19, %v584_v32 }
 0x277   : > { %p1818_p4 = pnand %p1817_p1, %p1981_p3  ;;  %p1823_p10 = por %p1822_p9, %p1821_p2 }
 0x278   : > { %v601_v10 = vmax.f32 %v599_v61, %v600_v3  ;;  %v614_v11 = vmax.f32 %v612_v62, %v613_v0  ;;  %v587_v25 = vmul.f32 0.015625, %v573_v23  ;;  %v588_v26 = vmul.f32 0.015625, %v586_v24 }
 0x279   : > { %v1118_v61 = vperm.slane %v1115_v21, 1  ;;  %p1819_p11 = pneg %p1818_p4 }
 0x27a   : > { %v649_v12 = vpack.c.bf16 %v601_v10, %v601_v10  ;;  %v650_v14 = vpack.c.bf16 %v614_v11, %v614_v11  ;;  %v615_v27 = vpack.c.bf16 %v587_v25, %v587_v25  ;;  %v616_v5 = vpack.c.bf16 %v588_v26, %v588_v26 }
 0x27b   : > { %v1117_v10 = vperm.slane %v1115_v21, 0  ;;  %p1824_p12 = pnand %p1823_p10, %p1819_p11 }
 0x27c   : > { %851 = vmatmul.bf16.vlgmr.msra.gmra.mxu2 %v649_v12  ;;  %864 = vmatmul.bf16.vlgmr.msra.gmra.mxu3 %v650_v14 }
 0x27d   : > { %877 = vmatmul.bf16.vlgmr.msrb.gmra.mxu1 %v649_v12  ;;  %890 = vmatmul.bf16.vlgmr.msrb.gmra.mxu0 %v650_v14 }
 0x28c   : > { %1063 = vmatmul.bf16.vlgmr.msrb.gmra.mxu2 %v615_v27  ;;  %1076 = vmatmul.bf16.vlgmr.msrb.gmra.mxu3 %v616_v5 }
 0x28d   : > { %1089 = vmatmul.bf16.vlgmr.msra.gmra.mxu1 %v615_v27  ;;  %1102 = vmatmul.bf16.vlgmr.msra.gmra.mxu0 %v616_v5 }
 0x2fa   : > { %v878_v6 = vpop.f32.mrf.mxu1  ;;  %v891_v28 = vpop.f32.mrf.mxu0 }
 0x2fb   : > { %v892_v48 = vadd.f32 %v891_v28, %v878_v6 }
 0x2ff   : > { %v852_v29 = vpop.f32.mrf.mxu2  ;;  %v865_v30 = vpop.f32.mrf.mxu3 }
 0x300   : > { %v866_v50 = vadd.f32 %v865_v30, %v852_v29 }
 0x302   : > { %v880_v38 = vpop.f32.mrf.mxu1  ;;  %v893_v39 = vpop.f32.mrf.mxu0 }
 0x307   : > { %v854_v40 = vpop.f32.mrf.mxu2  ;;  %v867_v41 = vpop.f32.mrf.mxu3 }
 0x30a   : > { %v1090_v17 = vpop.f32.mrf.mxu1  ;;  %v1103_v49 = vpop.f32.mrf.mxu0 }
 0x30b   : > { %v1091_v7 = vadd.f32 %v1090_v17, %v892_v48 }
 0x30d   : > { %v1104_v20 = vadd.f32 %v1103_v49, %v1091_v7 }
 0x30f   : > { %v1108_v8 = vmul.f32 0.5, %v1104_v20  ;;  %v1064_v53 = vpop.f32.mrf.mxu2  ;;  %v1077_v35 = vpop.f32.mrf.mxu3 }
 0x310   : > { %v1065_v54 = vadd.f32 %v1064_v53, %v866_v50 }
 0x311   : > { %1705 = vtanh.f32 %v1108_v8 }
 0x312   : > { %v1078_v36 = vadd.f32 %v1077_v35, %v1065_v54  ;;  %v1092_v55 = vpop.f32.mrf.mxu1  ;;  %v1105_v56 = vpop.f32.mrf.mxu0 }
 0x314   : > { %v1107_v16 = vmul.f32 0.5, %v1078_v36 }
 0x316   : > { %1707 = vtanh.f32 %v1107_v16 }
 0x317   : > { %v1706_v51 = vpop.eup %1705  ;;  %v1066_v59 = vpop.f32.mrf.mxu2 }
 0x318   : > { %v1079_v22 = vpop.f32.mrf.mxu3  ;;  %v1112_v60 = vmul.f32 0.5, %v1706_v51 }
 0x31a   : > { %v1114_v62 = vadd.f32 0.5, %v1112_v60 }
 0x31c   : > { %v1708_v3 = vpop.eup %1707  ;;  %v1122_v0 = vmul.f32 %v1118_v61, %v1114_v62 }
 0x31d   : > { %v1111_v1 = vmul.f32 0.5, %v1708_v3 }
 0x31e   : > { %v1124_v43 = vperm.slane %v1122_v0, 0 }
 0x31f   : > { %v1113_v11 = vadd.f32 0.5, %v1111_v1 }
 0x320   : > { %v1126_v12 = vmul.f32 %v1124_v43, %v2142_v13  ;;  %v1128_v14 = vmul.f32 %v1124_v43, %v2134_v47  ;;  %v1130_v15 = vmul.f32 %v1124_v43, %v2152_v9  ;;  %v1132_v32 = vmul.f32 %v1124_v43, %v2162_v33 }
 0x321   : > { %v1134_v34 = vmul.f32 %v1124_v43, %v2168_v42  ;;  %v1121_v13 = vmul.f32 %v1117_v10, %v1113_v11  ;;  %v1136_v47 = vmul.f32 %v1124_v43, %v2176_v52  ;;  %v1138_v9 = vmul.f32 %v1124_v43, %v2190_v2 }
 0x322   : > { %1142 = vst [vmem:[%s2222_s16 + $0x8] sm:$0xff] %v1126_v12  ;;  %v1140_v42 = vmul.f32 %v1124_v43, %v2208_v45 }
 0x323   : > { %1144 = vst [vmem:[%s2222_s16 + $0x18] sm:$0xff] %v1128_v14  ;;  %v1123_v33 = vperm.slane %v1121_v13, 0 }
 0x324   : > { %1146 = vst [vmem:[%s2222_s16 + $0x28] sm:$0xff] %v1130_v15 }
 0x325   : > { %1148 = vst [vmem:[%s2222_s16 + $0x38] sm:$0xff] %v1132_v32  ;;  %v1125_v19 = vmul.f32 %v1123_v33, %v2138_v58  ;;  %v1127_v52 = vmul.f32 %v1123_v33, %v2131_v46  ;;  %v1129_v2 = vmul.f32 %v1123_v33, %v2149_v4  ;;  %v1131_v45 = vmul.f32 %v1123_v33, %v2158_v31 }
 0x326   : > { %1150 = vst [vmem:[%s2222_s16 + $0x48] sm:$0xff] %v1134_v34  ;;  %v1133_v58 = vmul.f32 %v1123_v33, %v2165_v37  ;;  %v1135_v46 = vmul.f32 %v1123_v33, %v2173_v18  ;;  %v1137_v4 = vmul.f32 %v1123_v33, %v2187_v63  ;;  %v1139_v23 = vmul.f32 %v1123_v33, %v2205_v44 }
 0x327   : > { %1152 = vst [vmem:[%s2222_s16 + $0x58] sm:$0xff] %v1136_v47 }
 0x328   : > { %1154 = vst [vmem:[%s2222_s16 + $0x68] sm:$0xff] %v1138_v9 }
 0x329   : > { %1156 = vst [vmem:[%s2222_s16 + $0x78] sm:$0xff] %v1140_v42 }
 0x32a   : > { %1141 = vst [vmem:[%s2222_s16] sm:$0xff] %v1125_v19 }
 0x32b   : > { %1143 = vst [vmem:[%s2222_s16 + $0x10] sm:$0xff] %v1127_v52 }
 0x32c   : > { %1145 = vst [vmem:[%s2222_s16 + $0x20] sm:$0xff] %v1129_v2 }
 0x32d   : > { %1147 = vst [vmem:[%s2222_s16 + $0x30] sm:$0xff] %v1131_v45 }
 0x32e   : > { %1149 = vst [vmem:[%s2222_s16 + $0x40] sm:$0xff] %v1133_v58 }
 0x32f   : > { %1151 = vst [vmem:[%s2222_s16 + $0x50] sm:$0xff] %v1135_v46 }
 0x330   : > { %1153 = vst [vmem:[%s2222_s16 + $0x60] sm:$0xff] %v1137_v4 }
 0x331   : > { %1155 = vst [vmem:[%s2222_s16 + $0x70] sm:$0xff] %v1139_v23 }
 0x332   : > { %1827 = shalt.err (!%p1824_p12)
}
 0x333   : > { %s1878_s9 = smov 256   ;;  %s1879_s16 = smov 16  }
 0x334   : > { %1631 = dma.vmem_to_hbm [thread:$0]  (%p1981_p3), %s1171_s25, 2048, %s1173_s14, %s1158_s27, %s1878_s9, %s1878_s9, %s1879_s16  }
 0x335 PF: > { %s1187_s19 = sand.u32 1, %s1858_s21   ;;  %p2297_p13 = scmp.ge.s32.totalorder %s1870_s24, 2 }
 0x336   : > { %s1188_s20 = scalar_lea.sflag [#allocation4], %s1187_s19 }
 0x337   : > { %p1645_p0 = pnand %p2297_p13, %p1950_p6 }
 0x339   : > { %p1646_p5 = pneg %p1645_p0 }
 0x33b   : > { %1853 = dma.done.wait (%p1646_p5), %s1188_s20, 2048  }
 0x33c   : > { %1855 = vsyncadd (%p1646_p5), %s1188_s20, 4294965248  ;;  %p20_p7 = scmp.ge.s32.totalorder %s1971_s18, 4   ;;  %s2298_s21 = smov %s1862_s22 }
 0x33d   : > { %s2299_s22 = smov %s1866_s23  ;;  %s2300_s23 = smov %s1987_s29 }
 0x33e   : > { %s2301_s24 = smov %s1971_s18  ;;  %22 = sbr.rel (!%p20_p7) target bundleno = 6 (0x6), region = 100 }
 0x343   :  { %1194 = vsyncpa [#allocation3], 1 }
 0x344   :  { %1196 = vsyncpa [#allocation3 + $0x1], 1 }
 0x345   :  { %1197 = vsyncpa [#allocation6], 1 }
 0x346   :  { %1198 = vsyncpa [#allocation4], 1 }
 0x347   :  { %1200 = vsyncpa [#allocation4 + $0x1], 1 }

</bundles_post_ra>
